<compile_context>
chip_gen: v6e
topology: v6e:2x2x1
jax: 0.10.0
libtpu: 0.0.40
codegen_flags: <defaults>
</compile_context>

<pallas_src>
from functools import partial

import jax
import jax.numpy as jnp
from jax.experimental import pallas as pl
from jax.experimental.pallas import tpu as pltpu

IN_DIM = 3
H1 = 16
H2 = 8
OUT_DIM = 1

# Packed-parameter slab layout (f32, shape (32, 128)):
#   rows  0:16, cols 0:3   -> W1 (16, 3)      rows  0:16, col 3  -> b1 (16,)
#   rows 16:24, cols 0:16  -> W2 (8, 16)      rows 16:24, col 16 -> b2 (8,)
#   rows 24:32, col 0      -> W3^T (8,)       row  24,    col 1  -> b3 ()
_SLAB_ROWS = 32
_SLAB_COLS = 128

_MAX_TB = 64 * 1024          # ~64K lanes: safe under v7x's 64 MiB VMEM
_TARGET_GRID_STEPS = 4       # >=2 so v7x's two TensorCores both get work


def mlp_kernel(x_ref, p_ref, o_ref):
    # x_ref: (IN_DIM, TB)  -- batch on the 128-lane axis (lane-dense)
    # p_ref: (32, 128)     -- packed parameter slab (single DMA, VMEM-resident)
    # o_ref: (1, TB)       -- unmasked lane-dense output store
    x = x_ref[...]

    # ---- Layer 1: h1 = relu(W1 @ x + b1), K=3 -> MXU (f32 accumulation).
    w1 = p_ref[0:H1, 0:IN_DIM]                           # (16, 3)
    b1 = p_ref[0:H1, IN_DIM:IN_DIM + 1]                  # (16, 1)
    h1 = jnp.dot(w1, x, preferred_element_type=jnp.float32) + b1
    h1 = jnp.maximum(h1, 0.0)

    # ---- Layer 2: h2 = relu(W2 @ h1 + b2), K=16 -> MXU (f32 accumulation).
    w2 = p_ref[H1:H1 + H2, 0:H1]                         # (8, 16)
    b2 = p_ref[H1:H1 + H2, H1:H1 + 1]                    # (8, 1)
    h2 = jnp.dot(w2, h1, preferred_element_type=jnp.float32) + b2
    h2 = jnp.maximum(h2, 0.0)

    # ---- Layer 3: y = W3 @ h2 + b3, K=8 -> VPU multiply + sublane reduce (XLU).
    w3t = p_ref[H1 + H2:H1 + 2 * H2, 0:1]                # (8, 1) == W3^T
    b3 = p_ref[H1 + H2:H1 + H2 + 1, 1:2]                 # (1, 1)
    y = jnp.sum(w3t * h2, axis=0, keepdims=True) + b3    # (1, TB)

    o_ref[...] = y.astype(o_ref.dtype)


def pack_params(params):
    """Pack torch-layout (out,in)/(out,) params into one (32,128) f32 slab.

    Hoisted out of the per-call path: call once per parameter set and reuse.
    """
    w1, b1, w2, b2, w3, b3 = params
    slab = jnp.zeros((_SLAB_ROWS, _SLAB_COLS), jnp.float32)
    slab = slab.at[0:H1, 0:IN_DIM].set(w1.astype(jnp.float32))
    slab = slab.at[0:H1, IN_DIM].set(b1.astype(jnp.float32))
    slab = slab.at[H1:H1 + H2, 0:H1].set(w2.astype(jnp.float32))
    slab = slab.at[H1:H1 + H2, H1].set(b2.astype(jnp.float32))
    slab = slab.at[H1 + H2:H1 + 2 * H2, 0].set(w3[0, :].astype(jnp.float32))
    slab = slab.at[H1 + H2, 1].set(b3[0].astype(jnp.float32))
    return slab


def _pick_tile(batch):
    """Pick a lane tile: ~_TARGET_GRID_STEPS grid steps, multiple of 128, <=64K."""
    tb = pl.cdiv(batch, _TARGET_GRID_STEPS)
    tb = max(128, min(_MAX_TB, tb))
    return ((tb + 127) // 128) * 128


@partial(jax.jit, static_argnames=("tb",))
def simple_nn_forward(x, slab, tb=None):
    """x: (batch, 3) f32; slab: packed (32,128) params. Returns (batch, 1)."""
    batch, in_dim = x.shape
    assert in_dim == IN_DIM
    if tb is None:
        tb = _pick_tile(batch)
    assert tb % 128 == 0, "tb must be a multiple of the 128-lane width"

    # Lane-dense layout: batch on the lane axis; fused pad+transpose (no
    # zeros + scatter pass).
    b_pad = pl.cdiv(batch, tb) * tb
    x_t = jnp.pad(x.T.astype(jnp.float32), ((0, 0), (0, b_pad - batch)))

    grid = (b_pad // tb,)
    out = pl.pallas_call(
        mlp_kernel,
        out_shape=jax.ShapeDtypeStruct((1, b_pad), jnp.float32),
        grid=grid,
        in_specs=[
            # x: one (3, TB) batch tile per grid step (double-buffered by Pallas).
            pl.BlockSpec((IN_DIM, tb), lambda i: (0, i)),
            # Packed params: constant block index -> stays VMEM-resident.
            pl.BlockSpec((_SLAB_ROWS, _SLAB_COLS), lambda i: (0, 0)),
        ],
        out_specs=pl.BlockSpec((1, tb), lambda i: (0, i)),
        compiler_params=pltpu.CompilerParams(
            # Megacore batch split on v7x; measured no-op on single-TC v5e/v6e.
            dimension_semantics=("parallel",),
            # 32 MiB is ample for TB<=64K and leaves headroom on v7x (64 MiB).
            vmem_limit_bytes=32 * 1024 * 1024,
        ),
    )(x_t, slab)

    # Slice the valid lanes and reshape to the torch (batch, 1) shape
    # (slice + reshape of a row; no transpose pass).
    return out[0, :batch].reshape(batch, OUT_DIM)


def init_params(key, input_dim=IN_DIM, output_dim=OUT_DIM):
    # Deterministic synthetic init; torch nn.Linear layout: W (out,in), b (out,)
    ks = jax.random.split(key, 6)
    w1 = jax.random.normal(ks[0], (H1, input_dim), jnp.float32) * 0.5
    b1 = jax.random.normal(ks[1], (H1,), jnp.float32) * 0.1
    w2 = jax.random.normal(ks[2], (H2, H1), jnp.float32) * 0.5
    b2 = jax.random.normal(ks[3], (H2,), jnp.float32) * 0.1
    w3 = jax.random.normal(ks[4], (output_dim, H2), jnp.float32) * 0.5
    b3 = jax.random.normal(ks[5], (output_dim,), jnp.float32) * 0.1
    return (w1, b1, w2, b2, w3, b3)


def reference_forward(x, params):
    w1, b1, w2, b2, w3, b3 = params
    h1 = jnp.maximum(x @ w1.T + b1, 0.0)
    h2 = jnp.maximum(h1 @ w2.T + b2, 0.0)
    return h2 @ w3.T + b3


if __name__ == "__main__":
    key = jax.random.PRNGKey(0)
    k_x1, k_x2, k_x3, k_p = jax.random.split(key, 4)

    params = init_params(k_p)
    slab = pack_params(params)          # packed once, reused across calls

    # 1) Small batch (single tile) — matches the original script's scale.
    batch = 8
    x_small = jax.random.uniform(k_x1, (batch, IN_DIM), jnp.float32)
    y = jax.block_until_ready(simple_nn_forward(x_small, slab))
    assert y.shape == (batch, OUT_DIM)
    assert jnp.allclose(y, reference_forward(x_small, params), atol=1e-5, rtol=1e-5)

    # 2) Multi-tile grid + padding path: batch not a multiple of tb.
    batch2 = 1000
    x_mid = jax.random.uniform(k_x2, (batch2, IN_DIM), jnp.float32)
    y2 = jax.block_until_ready(simple_nn_forward(x_mid, slab, tb=256))
    assert y2.shape == (batch2, OUT_DIM)
    assert jnp.allclose(y2, reference_forward(x_mid, params), atol=1e-5, rtol=1e-5)

    # 3) Adaptive tiling path (grid of ~4 parallel steps).
    batch3 = 4096
    x_big = jax.random.uniform(k_x3, (batch3, IN_DIM), jnp.float32)
    y3 = jax.block_until_ready(simple_nn_forward(x_big, slab))
    assert y3.shape == (batch3, OUT_DIM)
    assert jnp.allclose(y3, reference_forward(x_big, params), atol=1e-5, rtol=1e-5)

    print("KERNEL_OK")
</pallas_src>

<mosaic_0001>
module attributes {stable_mosaic.version = 11 : i64} {
  func.func @mlp_kernel(%arg0: i32, %arg1: memref<3x128xf32, #tpu.memory_space<vmem>>, %arg2: memref<32x128xf32, #tpu.memory_space<vmem>>, %arg3: memref<1x128xf32, #tpu.memory_space<vmem>>) attributes {dimension_semantics = [#tpu.dimension_semantics<parallel>], iteration_bounds = array<i64: 1>, scalar_prefetch = 0 : i64, scratch_operands = 0 : i64, tpu.core_type = #tpu.core_type<tc>, window_params = [{transform_indices = @transform_0, window_bounds = array<i64: 3, 128>}, {pipeline_mode = #tpu.pipeline_mode<synchronous>, transform_indices = @transform_1, window_bounds = array<i64: 32, 128>}, {transform_indices = @transform_2, window_bounds = array<i64: 1, 128>}]} {
    %c0 = arith.constant 0 : index
    %c0_0 = arith.constant 0 : index
    %0 = vector.load %arg1[%c0, %c0_0] : memref<3x128xf32, #tpu.memory_space<vmem>>, vector<3x128xf32>
    %c0_1 = arith.constant 0 : index
    %c0_2 = arith.constant 0 : index
    %1 = vector.load %arg2[%c0_1, %c0_2] : memref<32x128xf32, #tpu.memory_space<vmem>>, vector<16x3xf32>
    %c0_3 = arith.constant 0 : index
    %c3 = arith.constant 3 : index
    %2 = vector.load %arg2[%c0_3, %c3] : memref<32x128xf32, #tpu.memory_space<vmem>>, vector<16x1xf32>
    %cst = arith.constant dense<0.000000e+00> : vector<16x128xf32>
    %3 = tpu.matmul %1, %0, %cst {dimension_numbers = #tpu.dot_dimension_numbers<[1], [0], [0], [1], [0, 0, 1, 1], [], []>} : vector<16x3xf32>, vector<3x128xf32>, vector<16x128xf32> -> vector<16x128xf32>
    %4 = vector.broadcast %2 : vector<16x1xf32> to vector<16x128xf32>
    %5 = arith.addf %3, %4 : vector<16x128xf32>
    %cst_4 = arith.constant 0.000000e+00 : f32
    %6 = vector.broadcast %cst_4 : f32 to vector<16x128xf32>
    %7 = arith.maximumf %5, %6 : vector<16x128xf32>
    %c16 = arith.constant 16 : index
    %c0_5 = arith.constant 0 : index
    %8 = vector.load %arg2[%c16, %c0_5] : memref<32x128xf32, #tpu.memory_space<vmem>>, vector<8x16xf32>
    %c16_6 = arith.constant 16 : index
    %c16_7 = arith.constant 16 : index
    %9 = vector.load %arg2[%c16_6, %c16_7] : memref<32x128xf32, #tpu.memory_space<vmem>>, vector<8x1xf32>
    %cst_8 = arith.constant dense<0.000000e+00> : vector<8x128xf32>
    %10 = tpu.matmul %8, %7, %cst_8 {dimension_numbers = #tpu.dot_dimension_numbers<[1], [0], [0], [1], [0, 0, 1, 1], [], []>} : vector<8x16xf32>, vector<16x128xf32>, vector<8x128xf32> -> vector<8x128xf32>
    %11 = vector.broadcast %9 : vector<8x1xf32> to vector<8x128xf32>
    %12 = arith.addf %10, %11 : vector<8x128xf32>
    %cst_9 = arith.constant 0.000000e+00 : f32
    %13 = vector.broadcast %cst_9 : f32 to vector<8x128xf32>
    %14 = arith.maximumf %12, %13 : vector<8x128xf32>
    %c24 = arith.constant 24 : index
    %c0_10 = arith.constant 0 : index
    %15 = vector.load %arg2[%c24, %c0_10] : memref<32x128xf32, #tpu.memory_space<vmem>>, vector<8x1xf32>
    %c24_11 = arith.constant 24 : index
    %c1 = arith.constant 1 : index
    %16 = vector.load %arg2[%c24_11, %c1] : memref<32x128xf32, #tpu.memory_space<vmem>>, vector<1x1xf32>
    %17 = vector.broadcast %15 : vector<8x1xf32> to vector<8x128xf32>
    %18 = arith.mulf %17, %14 : vector<8x128xf32>
    %cst_12 = arith.constant dense<0.000000e+00> : vector<128xf32>
    %19 = vector.multi_reduction <add>, %18, %cst_12 [0] : vector<8x128xf32> to vector<128xf32>
    %20 = vector.shape_cast %19 : vector<128xf32> to vector<1x128xf32>
    %21 = vector.broadcast %16 : vector<1x1xf32> to vector<1x128xf32>
    %22 = arith.addf %20, %21 : vector<1x128xf32>
    %c0_13 = arith.constant 0 : index
    %c0_14 = arith.constant 0 : index
    %23 = vector.load %arg3[%c0_13, %c0_14] : memref<1x128xf32, #tpu.memory_space<vmem>>, vector<1x128xf32>
    tpu.vector_store %arg3[%c0_13, %c0_14], %22 {strides = array<i32>} : memref<1x128xf32, #tpu.memory_space<vmem>>, vector<1x128xf32>,
    return
  }
  func.func @transform_0(%arg0: i32) -> (i32, i32) {
    %c0_i32 = arith.constant 0 : i32
    %c0_i32_0 = arith.constant 0 : i32
    return %c0_i32, %arg0 : i32, i32
  }
  func.func @transform_1(%arg0: i32) -> (i32, i32) {
    %c0_i32 = arith.constant 0 : i32
    %c0_i32_0 = arith.constant 0 : i32
    %c0_i32_1 = arith.constant 0 : i32
    return %c0_i32, %c0_i32_0 : i32, i32
  }
  func.func @transform_2(%arg0: i32) -> (i32, i32) {
    %c0_i32 = arith.constant 0 : i32
    %c0_i32_0 = arith.constant 0 : i32
    return %c0_i32, %arg0 : i32, i32
  }
}

</mosaic_0001>

<bundles_post_ra>
// kernel: simple_nn_forward.1
= control target key start
LH: loop header
LB: loop body
LE: loop exit
PB: predicated region body
PF: predicated region fallthrough
CT: control target
= control target key end

     0   :  { %7 = vsyncpa [#allocation3], 0  ;;  %s287_s9 = smov [#allocation2]   ;;  %s320_s0 = inlined_call_operand.vmem [shape: f32[3,128], index: 0, kind: input, shape index: {}]   ;;  %s321_s1 = inlined_call_operand.hbm [shape: f32[32,128], index: 1, kind: input, shape index: {}]   ;;  %s322_s2 = inlined_call_operand.vmem [shape: f32[1,128], index: 2, kind: output, shape index: {}]  }
   0x1   :  { %s15_s10 = sshll.u32 %s287_s9, 4  ;;  %s16_s10 = int_to_ptr.vmem [resolvable:$true] %s15_s10 }
   0x2   :  { %s273_s11 = scalar_lea.vmem %s16_s10, 512  ;;  %p278_p1 = scmp.lt.s32.totalorder %s16_s10, %s16_s10 }
   0x3   :  { %p274_p0 = scmp.ne.s32.totalorder %s16_s10, %s273_s11  ;;  %p279_p2 = scmp.lt.s32.totalorder %s273_s11, %s273_s11 }
   0x5   :  { %p280_p3 = por %p279_p2, %p278_p1 }
   0x7   :  { %p281_p4 = pnand %p280_p3, %p274_p0 }
   0x9   :  { %284 = shalt.err (!%p281_p4)
}
   0xa   :  { %s288_s12 = smov 128   ;;  %s289_s13 = smov 8  }
   0xb   :  { %21 = dma.hbm_to_vmem [thread:$0]  %s321_s1, 512, %s16_s10, [#allocation3], %s288_s12, %s288_s12, %s289_s13  }
   0xc   :  { %285 = dma.done.wait [#allocation3], 512  }
   0xd   :  { %286 = vsyncadd [#allocation3], 4294966784  ;;  %v290_v0 = vmov 3   ;;  %vm43_vm0 = vcmask 1042432   ;;  %vm38_vm1 = vcmask 23552   ;;  %v26_v2 = vld [vmem:[#allocation2] sm:$0xff] }
   0xe   :  { %261 = vset.pattern.permute.xlu0 %v290_v0  ;;  %v25_v1 = vld [vmem:[%s320_s0] sm:$0x7]  ;;  %v27_v3 = vld [vmem:[#allocation2 + $0x8] sm:$0xff]  ;;  %242 = vmatprep.mubr.msk.f32.mxu0 %vm38_vm1, %v26_v2  ;;  %v291_v4 = vmov 0.0   ;;  %vm292_vm2 = vmmov 0   ;;  %v124_v6 = vld [vmem:[#allocation2 + $0x10] sm:$0xff] }
   0xf   :  { %240 = vmatprep.subr.msk.mxu0 %vm43_vm0, %v25_v1  ;;  %35 = vperm.xlu0 %261, %v27_v3   ;;  %v205_v5 = vld [vmem:[#allocation2 + $0x18] sm:$0x1]  ;;  %v293_v7 = vmov 16   ;;  %v294_v8 = vmov 1   ;;  %v295_v10 = vmov 0   ;;  %vm130_vm3 = vcmask 130048  }
  0x10   :  { %241 = vmatpush3.msk.msra.mxu0 %vm43_vm0, %v25_v1  ;;  %245 = vmatprep.subr.mxu1 %v291_v4  ;;  %v204_v9 = vld [vmem:[#allocation2 + $0x18] sm:$0xff] }
  0x11   :  { %243 = vmatmul.mubr.msk.f32.vlgmr.msra.gmra.mxu0 %vm38_vm1, %v27_v3  ;;  %249 = vmatprep.mubr.msk.f32.mxu1 %vm292_vm2, %v291_v4 }
  0x12   :  { %262 = vset.pattern.permute.xlu1 %v293_v7 }
  0x13   :  { %30 = vperm.xlu0 %261, %v26_v2   ;;  %127 = vperm.xlu1 %262, %v124_v6  }
  0x17   :  { %264 = vset.pattern.permute.xlu0 %v294_v8  ;;  %263 = vset.pattern.permute.xlu1 %v295_v10 }
  0x18   :  { %220 = vperm.xlu0 %264, %v205_v5   ;;  %208 = vperm.xlu1 %263, %v204_v9  }
  0x8a   :  { %v36_v11 = vpop.permute.xlu0 %35 }
  0x8e   :  { %v31_v14 = vpop.permute.xlu0 %30  ;;  %v128_v19 = vpop.permute.xlu1 %127 }
  0x93   :  { %v209_v23 = vpop.permute.xlu1 %208  ;;  %v221_v31 = vpop.permute.xlu0 %220 }
  0xd1   :  { %v244_v12 = vpop.f32.mrf.mxu0 }
  0xd2   :  { %v119_v13 = vadd.f32 %v244_v12, %v36_v11 }
  0xd3   :  { %v113_v15 = vpop.f32.mrf.mxu0 }
  0xd4   :  { %v123_v16 = vmax.f32 %v119_v13, 0.0  ;;  %v114_v17 = vadd.f32 %v113_v15, %v31_v14 }
  0xd6   :  { %v122_v18 = vmax.f32 %v114_v17, 0.0  ;;  %246 = vmatpush3.msra.mxu1 %v123_v16 }
  0xd7   :  { %247 = vmatprep.subr.mxu1 %v291_v4 }
  0xd8   :  { %248 = vmatpush3.msra.mxu1 %v122_v18 }
  0xd9   :  { %250 = vmatmul.mubr.msk.f32.vlgmr.msra.gmra.mxu1 %vm130_vm3, %v124_v6 }
 0x199   :  { %v199_v20 = vpop.f32.mrf.mxu1 }
 0x19a   :  { %v200_v21 = vadd.f32 %v199_v20, %v128_v19 }
 0x19b   :  { %v251_v22 = vpop.f32.mrf.mxu1 }
 0x19c   :  { %v203_v24 = vmax.f32 %v200_v21, 0.0 }
 0x19e   :  { %v211_v25 = vmul.f32 %v209_v23, %v203_v24 }
 0x1a0   :  { %v212_v26 = vrot.slane %v211_v25, 4 }
 0x1a2   :  { %v213_v27 = vadd.f32 %v212_v26, %v211_v25 }
 0x1a4   :  { %v214_v28 = vrot.slane %v213_v27, 2 }
 0x1a6   :  { %v215_v29 = vadd.f32 %v214_v28, %v213_v27 }
 0x1a8   :  { %v216_v30 = vrot.slane %v215_v29, 1 }
 0x1aa   :  { %v217_v32 = vadd.f32 %v216_v30, %v215_v29 }
 0x1ac   :  { %v223_v33 = vadd.f32 %v221_v31, %v217_v32 }
 0x1ae   :  { %224 = vst [vmem:[%s322_s2] sm:$0x1] %v223_v33 }
 0x1af   :  { %229 = vsyncpa [#allocation3], 1 }

</bundles_post_ra>
